<compile_context>
chip_gen: v7x
topology: tpu7x:2x2x1
jax: 0.10.0
libtpu: 0.0.40
codegen_flags: <defaults>
</compile_context>

<pallas_src>
import functools
from math import sqrt

import jax
import jax.numpy as jnp
from jax.experimental import pallas as pl
from jax.experimental.pallas import tpu as pltpu


_VMEM_LIMIT = 32 * 1024 * 1024    # safe on every generation (v7x phys 64 MiB; raises v5e's 16 MiB default)
_TILE_BUDGET = 24 * 1024 * 1024   # headroom under _VMEM_LIMIT used by the tile chooser


def _round_up(x, m):
    return (x + m - 1) // m * m


def _choose_tile_n(n, d, x_itemsize, w_itemsize, sublane):
    """Largest row tile such that streamed x + resident weights stay inside VMEM."""
    # Resident operands (the pipeliner double-buffers every input): W1 (d,d),
    # W2 (d,3), plus a handful of (1,d)/(1,3) f32 vectors.
    resident = 2 * (d * d * w_itemsize + d * 3 * w_itemsize + 6 * d * 4 + 2 * 3 * 4)
    avail = max(_TILE_BUDGET - resident, 1 << 20)
    # Per row: double-buffered streamed x (input dtype) + in-kernel cast copy
    # + f32 h + misc slack.
    per_row = d * (2 * x_itemsize + x_itemsize + 4 + 4) + 64
    # Small D -> per-row footprint is tiny; let tiles grow so per-grid-step
    # overhead (~0.35 us) stays negligible vs DMA time.
    cap = 8192 if d <= 128 else 2048
    tile = min(cap, avail // per_row)
    tile = max(sublane, tile // sublane * sublane)
    return min(tile, _round_up(n, sublane))
    # TODO(synk): for hidden dims where W1 alone exceeds the VMEM budget (D >~ 1.4K f32
    # on v7x) a K-tiling grid axis (or bf16-stored weights) would be needed.


# ----------------------------- Pallas kernels ------------------------------ #

def _linear_decoder_kernel(x_ref, w_ref, b_ref, o_ref, *, compute_dtype):
    # Pure HBM-streaming kernel: y = x @ W (pre-transposed to (D, 3)) + b.
    x = x_ref[...].astype(compute_dtype)
    y = jnp.dot(x, w_ref[...], preferred_element_type=jnp.float32)
    o_ref[...] = (y + b_ref[...]).astype(o_ref.dtype)


def _mlp_stats_kernel(x_ref, w1_ref, b1_ref, stats_ref, *,
                      compute_dtype, tile_n, tiles_per_group, n_valid):
    # Pass 1: accumulate per-feature sum / sum-of-squares of h = x@W1 + b1 over
    # the rows owned by this group (BatchNorm training-mode batch statistics).
    @pl.when(pl.program_id(1) == 0)
    def _():
        stats_ref[...] = jnp.zeros_like(stats_ref)

    x = x_ref[...].astype(compute_dtype)
    h = jnp.dot(x, w1_ref[...], preferred_element_type=jnp.float32) + b1_ref[...]

    # Mask rows past N (remainder tile and, for odd tile counts, the clamped
    # duplicate tile of group 1).  Cheap (tile_n, 1) iota broadcast.
    base = (pl.program_id(0) * tiles_per_group + pl.program_id(1)) * tile_n
    row = jax.lax.broadcasted_iota(jnp.int32, (tile_n, 1), 0)
    h = jnp.where(row < (n_valid - base), h, 0.0)

    stats_ref[0:1, :] += jnp.sum(h, axis=0, keepdims=True)
    stats_ref[1:2, :] += jnp.sum(h * h, axis=0, keepdims=True)


def _mlp_apply_kernel(x_ref, w1_ref, b1_ref, scale_ref, shift_ref,
                      w2_ref, b2_ref, o_ref, *, compute_dtype):
    # Pass 2: recompute h = x@W1 + b1, folded BN (one FMA), swish, D->3 matmul.
    x = x_ref[...].astype(compute_dtype)
    h = jnp.dot(x, w1_ref[...], preferred_element_type=jnp.float32) + b1_ref[...]
    h = h * scale_ref[...] + shift_ref[...]
    # swish = h * sigmoid(h); exact reciprocal (EUP cost is hidden under DMA).
    h = h * pl.reciprocal(1.0 + jnp.exp(-h), approx=False)
    y = jnp.dot(h.astype(w2_ref.dtype), w2_ref[...], preferred_element_type=jnp.float32)
    o_ref[...] = (y + b2_ref[...]).astype(o_ref.dtype)


# ------------------------------ JAX wrapper -------------------------------- #

def _xavier_uniform(key, out_dim, in_dim, dtype=jnp.float32):
    # Matches torch.nn.init.xavier_uniform_ on a (out, in) weight.
    bound = sqrt(6.0 / (in_dim + out_dim))
    return jax.random.uniform(key, (out_dim, in_dim), dtype, -bound, bound)


class FNDecoder:
    """JAX/Pallas port of ocpmodels FNDecoder (swish activation)."""

    def __init__(self, decoder_type, output_dim, key,
                 compute_dtype=jnp.float32, tile_n=None):
        self.decoder_type = decoder_type
        self.output_dim = output_dim
        self.compute_dtype = compute_dtype          # MXU operand dtype (bf16 recommended on HW)
        self.tile_n = tile_n

        if decoder_type == "linear":
            # Weights stored pre-transposed -> no per-call .T (extra XLA transpose).
            self.w_t = _xavier_uniform(key, 3, output_dim).T.astype(compute_dtype)   # (D, 3)
            self.b = jnp.zeros((1, 3), jnp.float32)
        elif decoder_type == "mlp":
            k1, k2 = jax.random.split(key, 2)
            self.w1_t = _xavier_uniform(k1, output_dim, output_dim).T.astype(compute_dtype)  # (D, D)
            self.b1 = jnp.zeros((1, output_dim), jnp.float32)
            self.gamma = jnp.ones((1, output_dim), jnp.float32)    # fresh BN params
            self.beta = jnp.zeros((1, output_dim), jnp.float32)
            self.w2_t = _xavier_uniform(k2, 3, output_dim).T.astype(compute_dtype)           # (D, 3)
            self.b2 = jnp.zeros((1, 3), jnp.float32)
        else:
            raise ValueError(f"Undefined force decoder: {decoder_type}")
        # TODO(synk): PyTorch BatchNorm1d also updates running_mean/running_var in
        # training mode; forward output does not depend on them, so they are omitted.

    def __call__(self, x):
        n, d = x.shape
        assert d == self.output_dim
        out_dtype = x.dtype
        cdt = self.compute_dtype
        sub = 16 if jnp.dtype(cdt).itemsize == 2 else 8   # bf16 packs 2 rows/sublane

        if self.tile_n is not None:
            tile_n = min(_round_up(self.tile_n, sub), _round_up(n, sub))
        else:
            tile_n = _choose_tile_n(n, d, jnp.dtype(x.dtype).itemsize,
                                    jnp.dtype(cdt).itemsize, sub)
        n_tiles = pl.cdiv(n, tile_n)

        x_spec = pl.BlockSpec((tile_n, d), lambda i: (i, 0))
        out_spec = pl.BlockSpec((tile_n, 3), lambda i: (i, 0))

        if self.decoder_type == "linear":
            return pl.pallas_call(
                functools.partial(_linear_decoder_kernel, compute_dtype=cdt),
                grid=(n_tiles,),
                in_specs=[x_spec,
                          pl.BlockSpec((d, 3), lambda i: (0, 0)),
                          pl.BlockSpec((1, 3), lambda i: (0, 0))],
                out_specs=out_spec,
                out_shape=jax.ShapeDtypeStruct((n, 3), out_dtype),
                compiler_params=pltpu.CompilerParams(
                    dimension_semantics=("parallel",),
                    vmem_limit_bytes=_VMEM_LIMIT),
            )(x, self.w_t, self.b)

        # --- mlp: pass 1 -- batch statistics over the full N axis --------------
        # Two groups -> on v7x each TensorCore reduces half the tiles into its
        # own (8, D) partial-stats slot; single-TC chips just run them serially.
        groups = 2 if n_tiles >= 2 else 1
        tpg = pl.cdiv(n_tiles, groups)

        stats = pl.pallas_call(
            functools.partial(_mlp_stats_kernel, compute_dtype=cdt, tile_n=tile_n,
                              tiles_per_group=tpg, n_valid=n),
            grid=(groups, tpg),
            in_specs=[
                # Clamp the block index for the (possible) duplicate tile when
                # n_tiles is odd; its rows are fully masked inside the kernel.
                pl.BlockSpec((tile_n, d),
                             lambda c, i: (jnp.minimum(c * tpg + i, n_tiles - 1), 0)),
                pl.BlockSpec((d, d), lambda c, i: (0, 0)),
                pl.BlockSpec((1, d), lambda c, i: (0, 0))],
            out_specs=pl.BlockSpec((None, 8, d), lambda c, i: (c, 0, 0)),
            out_shape=jax.ShapeDtypeStruct((groups, 8, d), jnp.float32),
            compiler_params=pltpu.CompilerParams(
                dimension_semantics=("parallel", "arbitrary"),
                vmem_limit_bytes=_VMEM_LIMIT),
        )(x, self.w1_t, self.b1)

        # Fold BatchNorm (training-mode batch stats) into a single scale/shift FMA.
        total = jnp.sum(stats, axis=0)          # (8, d): row 0 = sum(h), row 1 = sum(h^2)
        eps = 1e-5
        inv_n = 1.0 / float(n)
        mean = total[0:1, :] * inv_n
        # TODO(synk): E[h^2]-mean^2 can cancel when |mean| >> std; a shifted
        # sum((h-c)^2) accumulation would be more robust if that regime matters.
        var = jnp.maximum(total[1:2, :] * inv_n - mean * mean, 0.0)
        scale = self.gamma * jax.lax.rsqrt(var + eps)
        shift = self.beta - mean * scale

        # --- mlp: pass 2 -- recompute x@W1, normalize, swish, D->3 -------------
        return pl.pallas_call(
            functools.partial(_mlp_apply_kernel, compute_dtype=cdt),
            grid=(n_tiles,),
            in_specs=[x_spec,
                      pl.BlockSpec((d, d), lambda i: (0, 0)),
                      pl.BlockSpec((1, d), lambda i: (0, 0)),
                      pl.BlockSpec((1, d), lambda i: (0, 0)),
                      pl.BlockSpec((1, d), lambda i: (0, 0)),
                      pl.BlockSpec((d, 3), lambda i: (0, 0)),
                      pl.BlockSpec((1, 3), lambda i: (0, 0))],
            out_specs=out_spec,
            out_shape=jax.ShapeDtypeStruct((n, 3), out_dtype),
            compiler_params=pltpu.CompilerParams(
                dimension_semantics=("parallel",),
                vmem_limit_bytes=_VMEM_LIMIT),
        )(x, self.w1_t, self.b1, scale, shift, self.w2_t, self.b2)

    # Pure-JAX reference (same math, two-pass BN form), for correctness checking.
    def reference(self, x):
        xf = x.astype(jnp.float32)
        if self.decoder_type == "linear":
            return (xf @ self.w_t.astype(jnp.float32) + self.b).astype(x.dtype)
        w1 = self.w1_t.astype(jnp.float32)
        w2 = self.w2_t.astype(jnp.float32)
        h = xf @ w1 + self.b1
        mean = jnp.mean(h, axis=0, keepdims=True)
        var = jnp.mean((h - mean) ** 2, axis=0, keepdims=True)
        h = (h - mean) * jax.lax.rsqrt(var + 1e-5) * self.gamma + self.beta
        h = h * jax.nn.sigmoid(h)
        return (h @ w2 + self.b2).astype(x.dtype)


# ---------------------------------- main ------------------------------------ #

if __name__ == "__main__":
    key = jax.random.PRNGKey(0)
    kx, kp_lin, kp_mlp = jax.random.split(key, 3)

    N, D = 52, 32          # N nodes (not a multiple of the tile), hidden/output_dim D
    TILE = 16              # small tile: multi-tile grid, 2-group stats, masked remainder
    x = jax.random.normal(kx, (N, D), jnp.float32)

    # 'mlp' decoder (matmul + full-N BatchNorm + swish + matmul), f32 path.
    dec_mlp = FNDecoder("mlp", D, kp_mlp, tile_n=TILE)
    y_mlp = jax.block_until_ready(dec_mlp(x))
    assert y_mlp.shape == (N, 3)
    assert jnp.allclose(y_mlp, dec_mlp.reference(x), atol=1e-3, rtol=1e-3)

    # 'linear' decoder.
    dec_lin = FNDecoder("linear", D, kp_lin, tile_n=TILE)
    y_lin = jax.block_until_ready(dec_lin(x))
    assert y_lin.shape == (N, 3)
    assert jnp.allclose(y_lin, dec_lin.reference(x), atol=1e-4, rtol=1e-4)

    # bf16 MXU-operand path (in-kernel cast, f32 accumulate, f32 BN/swish).
    dec_bf16 = FNDecoder("mlp", D, kp_mlp, compute_dtype=jnp.bfloat16, tile_n=TILE)
    y_bf16 = jax.block_until_ready(dec_bf16(x))
    assert y_bf16.shape == (N, 3)
    assert jnp.allclose(y_bf16, dec_bf16.reference(x), atol=5e-2, rtol=5e-2)

    # Automatic (weight-aware) tile chooser path: single tile covers all rows.
    dec_auto = FNDecoder("mlp", D, kp_mlp)
    y_auto = jax.block_until_ready(dec_auto(x))
    assert y_auto.shape == (N, 3)
    assert jnp.allclose(y_auto, dec_auto.reference(x), atol=1e-3, rtol=1e-3)

    print("KERNEL_OK")
</pallas_src>

<mosaic_0001>
module attributes {stable_mosaic.version = 11 : i64} {
  func.func @_mlp_stats_kernel(%arg0: i32, %arg1: i32, %arg2: memref<16x32xf32, #tpu.memory_space<vmem>>, %arg3: memref<32x32xf32, #tpu.memory_space<vmem>>, %arg4: memref<1x32xf32, #tpu.memory_space<vmem>>, %arg5: memref<1x8x32xf32, #tpu.memory_space<vmem>>) attributes {dimension_semantics = [#tpu.dimension_semantics<parallel>, #tpu.dimension_semantics<arbitrary>], iteration_bounds = array<i64: 2, 2>, scalar_prefetch = 0 : i64, scratch_operands = 0 : i64, tpu.core_type = #tpu.core_type<tc>, window_params = [{transform_indices = @transform_0, window_bounds = array<i64: 16, 32>}, {pipeline_mode = #tpu.pipeline_mode<synchronous>, transform_indices = @transform_1, window_bounds = array<i64: 32, 32>}, {pipeline_mode = #tpu.pipeline_mode<synchronous>, transform_indices = @transform_2, window_bounds = array<i64: 1, 32>}, {transform_indices = @transform_3, window_bounds = array<i64: 1, 8, 32>}]} {
    %c0_i32 = arith.constant 0 : i32
    %0 = arith.cmpi eq, %arg1, %c0_i32 : i32
    %1 = arith.extui %0 : i1 to i32
    %c0_i32_0 = arith.constant 0 : i32
    %2 = arith.cmpi ne, %1, %c0_i32_0 : i32
    scf.if %2 {
      %cst_20 = arith.constant 0.000000e+00 : f32
      %37 = vector.broadcast %cst_20 : f32 to vector<8x32xf32>
      %c0_21 = arith.constant 0 : index
      %c0_22 = arith.constant 0 : index
      %c0_23 = arith.constant 0 : index
      %38 = vector.load %arg5[%c0_21, %c0_22, %c0_23] : memref<1x8x32xf32, #tpu.memory_space<vmem>>, vector<1x8x32xf32>
      %39 = vector.shape_cast %38 : vector<1x8x32xf32> to vector<8x32xf32>
      %40 = vector.shape_cast %37 : vector<8x32xf32> to vector<1x8x32xf32>
      tpu.vector_store %arg5[%c0_21, %c0_22, %c0_23], %40 {strides = array<i32>} : memref<1x8x32xf32, #tpu.memory_space<vmem>>, vector<1x8x32xf32>,
    } else {
    }
    %c0 = arith.constant 0 : index
    %c0_1 = arith.constant 0 : index
    %3 = vector.load %arg2[%c0, %c0_1] : memref<16x32xf32, #tpu.memory_space<vmem>>, vector<16x32xf32>
    %c0_2 = arith.constant 0 : index
    %c0_3 = arith.constant 0 : index
    %4 = vector.load %arg3[%c0_2, %c0_3] : memref<32x32xf32, #tpu.memory_space<vmem>>, vector<32x32xf32>
    %cst = arith.constant dense<0.000000e+00> : vector<16x32xf32>
    %5 = tpu.matmul %3, %4, %cst {dimension_numbers = #tpu.dot_dimension_numbers<[1], [0], [0], [1], [0, 0, 1, 1], [], []>} : vector<16x32xf32>, vector<32x32xf32>, vector<16x32xf32> -> vector<16x32xf32>
    %c0_4 = arith.constant 0 : index
    %c0_5 = arith.constant 0 : index
    %6 = vector.load %arg4[%c0_4, %c0_5] : memref<1x32xf32, #tpu.memory_space<vmem>>, vector<1x32xf32>
    %7 = vector.broadcast %6 : vector<1x32xf32> to vector<16x32xf32>
    %8 = arith.addf %5, %7 : vector<16x32xf32>
    %c2_i32 = arith.constant 2 : i32
    %9 = arith.muli %arg0, %c2_i32 : i32
    %10 = arith.addi %9, %arg1 : i32
    %c16_i32 = arith.constant 16 : i32
    %11 = arith.muli %10, %c16_i32 : i32
    %12 = tpu.iota {dimensions = array<i32: 0>} : vector<16x1xi32>
    %c52_i32 = arith.constant 52 : i32
    %13 = arith.subi %c52_i32, %11 : i32
    %14 = vector.broadcast %13 : i32 to vector<16x1xi32>
    %15 = arith.cmpi slt, %12, %14 : vector<16x1xi32>
    %cst_6 = arith.constant 0.000000e+00 : f32
    %16 = vector.shape_cast %15 : vector<16x1xi1> to vector<16x1xi1>
    %17 = vector.broadcast %16 : vector<16x1xi1> to vector<16x32xi1>
    %18 = vector.broadcast %cst_6 : f32 to vector<16x32xf32>
    %19 = arith.select %17, %8, %18 : vector<16x32xi1>, vector<16x32xf32>
    %c0_7 = arith.constant 0 : index
    %c0_8 = arith.constant 0 : index
    %c0_9 = arith.constant 0 : index
    %20 = vector.load %arg5[%c0_7, %c0_8, %c0_9] : memref<1x8x32xf32, #tpu.memory_space<vmem>>, vector<1x1x32xf32>
    %21 = vector.shape_cast %20 : vector<1x1x32xf32> to vector<1x32xf32>
    %cst_10 = arith.constant dense<0.000000e+00> : vector<32xf32>
    %22 = vector.multi_reduction <add>, %19, %cst_10 [0] : vector<16x32xf32> to vector<32xf32>
    %23 = vector.shape_cast %22 : vector<32xf32> to vector<1x32xf32>
    %24 = arith.addf %21, %23 : vector<1x32xf32>
    %c0_11 = arith.constant 0 : index
    %c0_12 = arith.constant 0 : index
    %c0_13 = arith.constant 0 : index
    %25 = vector.load %arg5[%c0_11, %c0_12, %c0_13] : memref<1x8x32xf32, #tpu.memory_space<vmem>>, vector<1x1x32xf32>
    %26 = vector.shape_cast %25 : vector<1x1x32xf32> to vector<1x32xf32>
    %27 = vector.shape_cast %24 : vector<1x32xf32> to vector<1x1x32xf32>
    tpu.vector_store %arg5[%c0_11, %c0_12, %c0_13], %27 {strides = array<i32>} : memref<1x8x32xf32, #tpu.memory_space<vmem>>, vector<1x1x32xf32>,
    %c0_14 = arith.constant 0 : index
    %c1 = arith.constant 1 : index
    %c0_15 = arith.constant 0 : index
    %28 = vector.load %arg5[%c0_14, %c1, %c0_15] : memref<1x8x32xf32, #tpu.memory_space<vmem>>, vector<1x1x32xf32>
    %29 = vector.shape_cast %28 : vector<1x1x32xf32> to vector<1x32xf32>
    %30 = arith.mulf %19, %19 : vector<16x32xf32>
    %cst_16 = arith.constant dense<0.000000e+00> : vector<32xf32>
    %31 = vector.multi_reduction <add>, %30, %cst_16 [0] : vector<16x32xf32> to vector<32xf32>
    %32 = vector.shape_cast %31 : vector<32xf32> to vector<1x32xf32>
    %33 = arith.addf %29, %32 : vector<1x32xf32>
    %c0_17 = arith.constant 0 : index
    %c1_18 = arith.constant 1 : index
    %c0_19 = arith.constant 0 : index
    %34 = vector.load %arg5[%c0_17, %c1_18, %c0_19] : memref<1x8x32xf32, #tpu.memory_space<vmem>>, vector<1x1x32xf32>
    %35 = vector.shape_cast %34 : vector<1x1x32xf32> to vector<1x32xf32>
    %36 = vector.shape_cast %33 : vector<1x32xf32> to vector<1x1x32xf32>
    tpu.vector_store %arg5[%c0_17, %c1_18, %c0_19], %36 {strides = array<i32>} : memref<1x8x32xf32, #tpu.memory_space<vmem>>, vector<1x1x32xf32>,
    return
  }
  func.func @transform_0(%arg0: i32, %arg1: i32) -> (i32, i32) {
    %c2_i32 = arith.constant 2 : i32
    %0 = arith.muli %arg0, %c2_i32 : i32
    %1 = arith.addi %0, %arg1 : i32
    %c3_i32 = arith.constant 3 : i32
    %2 = arith.minsi %1, %c3_i32 : i32
    %c0_i32 = arith.constant 0 : i32
    %c0_i32_0 = arith.constant 0 : i32
    return %2, %c0_i32 : i32, i32
  }
  func.func @transform_1(%arg0: i32, %arg1: i32) -> (i32, i32) {
    %c0_i32 = arith.constant 0 : i32
    %c0_i32_0 = arith.constant 0 : i32
    %c0_i32_1 = arith.constant 0 : i32
    return %c0_i32, %c0_i32_0 : i32, i32
  }
  func.func @transform_2(%arg0: i32, %arg1: i32) -> (i32, i32) {
    %c0_i32 = arith.constant 0 : i32
    %c0_i32_0 = arith.constant 0 : i32
    %c0_i32_1 = arith.constant 0 : i32
    return %c0_i32, %c0_i32_0 : i32, i32
  }
  func.func @transform_3(%arg0: i32, %arg1: i32) -> (i32, i32, i32) {
    %c0_i32 = arith.constant 0 : i32
    %c0_i32_0 = arith.constant 0 : i32
    %c0_i32_1 = arith.constant 0 : i32
    return %arg0, %c0_i32, %c0_i32_0 : i32, i32, i32
  }
}

</mosaic_0001>

<bundles_post_ra>
// kernel: tpu_custom_call.1
= control target key start
LH: loop header
LB: loop body
LE: loop exit
PB: predicated region body
PF: predicated region fallthrough
CT: control target
= control target key end

     0   :  { %8 = vsyncpa [#allocation3], 0  ;;  %s866_s0 = inlined_call_operand.vmem [shape: f32[52,32], index: 0, kind: input, shape index: {}]   ;;  %s867_s1 = inlined_call_operand.vmem [shape: f32[32,32], index: 1, kind: input, shape index: {}]   ;;  %s868_s2 = inlined_call_operand.vmem [shape: f32[1,32], index: 2, kind: input, shape index: {}]   ;;  %s869_s3 = inlined_call_operand.hbm [shape: f32[2,8,32], index: 3, kind: output, shape index: {}]  }
   0x1   :  { %10 = vsyncpa [#allocation3 + $0x1], 0  ;;  %s695_s12 = smov 0   ;;  %s697_s13 = smov 0  }
   0x2   :  { %s699_s14 = smov 0   ;;  %s701_s15 = smov 0  }
   0x3   :  { %s703_s16 = smov 0   ;;  %s705_s17 = smov 0  }
   0x4   :  { %s707_s18 = smov 0   ;;  %s709_s19 = smov 0  }
   0x5 LB: > { %s459_s20 = sadd.s32 4294967295, %s671_s19   ;;  %s460_s21 = sadd.s32 4294967294, %s671_s19   ;;  %s671_s19 = sphi %s709_s19, %s16_s19   ;;  %s667_s18 = sphi %s707_s18, %s878_s18   ;;  %s663_s17 = sphi %s705_s17, %s877_s17   ;;  %s659_s16 = sphi %s703_s16, %s876_s16   ;;  %s655_s15 = sphi %s701_s15, %s875_s15   ;;  %s651_s14 = sphi %s699_s14, %s874_s14   ;;  %s647_s13 = sphi %s697_s13, %s873_s13   ;;  %s643_s12 = sphi %s695_s12, %s872_s12  }
   0x6   : > { %s25_s22 = sadd.s32 1, %s663_s17  ;;  %s28_s23 = sadd.s32 1, %s667_s18 }
   0x7   : > { %p26_p0 = scmp.ge.s32.totalorder %s25_s22, 2  ;;  %p121_p1 = scmp.ne.s32.totalorder %s651_s14, %s647_s13 }
   0x8   : > { %p122_p2 = scmp.eq.s32.totalorder %s459_s20, 3  ;;  %p127_p4 = scmp.ne.s32.totalorder %s647_s13, %s643_s12 }
   0x9   : > { %s880_s22 = smov (%p26_p0, %s25_s22), 0  ;;  %s882_s23 = smov (!%p26_p0, %s28_s23), %s667_s18 }
   0xa   : > { %p744_p3 = por %p122_p2, %p121_p1  ;;  %p30_p5 = scmp.ge.s32.totalorder %s882_s23, 2 }
   0xb   : > { %p128_p6 = scmp.eq.s32.totalorder %s460_s21, 3  ;;  %p465_p7 = scmp.ge.s32.totalorder %s671_s19, 1 }
   0xc   : > { %p177_p8 = scmp.lt.s32.totalorder %s671_s19, 5  ;;  %s884_s23 = smov (%p30_p5, %s882_s23), 0 }
   0xd   : > { %p754_p9 = por %p128_p6, %p127_p4  ;;  %s108_s26 = ssub.s32 %s667_s18, %s884_s23 }
   0xe   : > { %p178_p10 = pnand %p465_p7, %p177_p8  ;;  %s111_s27 = sadd.s32 1, %s651_s14 }
   0xf   : > { %p109_p11 = scmp.eq.s32.totalorder %s108_s26, 0  ;;  %s206_s29 = sand.u32 (!%p178_p10), 1, %s647_s13  }
  0x10   : > { %181 = sbr.rel (%p178_p10) target bundleno = 291 (0x123), region = 32  ;;  %s467_s30 = sshll.u32 (!%p178_p10), %s659_s16, 1 }
  0x11   : > { %s762_s28 = scalar_select %p109_p11, %s651_s14, %s111_s27  }
  0x12   : > { %s466_s4 = sshll.u32 (!%p178_p10), %s206_s29, 3  ;;  %s769_s5 = sadd.s32 (!%p178_p10), %s655_s15, %s467_s30 }
  0x13   : > { %p211_p12 = scmp.lt.s32.totalorder (!%p178_p10), %s769_s5, 3  ;;  %s776_s20 = scalar_lea.vmem (!%p178_p10), [#allocation2], %s466_s4 }
  0x14   : > { %p470_p0 = scmp.ne.s32.totalorder (!%p178_p10), %s655_s15, 0 }
  0x17   : > { %s212_s6 = scalar_select %p211_p12, %s769_s5, 3 }
  0x18   : > { %234 = sbr.rel (%p470_p0) target bundleno = 31 (0x1f), region = 36  ;;  %vm235_vm0 = vcmask (!%p470_p0), 261120   ;;  %v673_v0 = vmov (!%p470_p0), 0.0  }
  0x19   : > { %s468_s7 = sshll.u32 %s212_s6, 1  ;;  %236 = vst.msk [vmem:[%s776_s20] sm:$0xff] (!%p470_p0), %vm235_vm0, %v673_v0 }
  0x1a   : > { %p218_p13 = scmp.lt.s32.totalorder %s468_s7, 6 }
  0x1c   : > { %s886_s7 = smov (!%p218_p13, %s468_s7), 6 }
  0x1d   : > { %s469_s8 = sshll.u32 %s886_s7, 3 }
  0x1e   : > { %s221_s11 = scalar_lea.vmem %s866_s0, %s469_s8 }
  0x1f PF: > { %v239_v1 = vld [vmem:[%s867_s1] sm:$0xff]  ;;  %v240_v2 = vld [vmem:[%s867_s1 + $0x8] sm:$0xff]  ;;  %v241_v3 = vld [vmem:[%s867_s1 + $0x10] sm:$0xff]  ;;  %vm250_vm1 = vcmask 261120   ;;  %v335_v9 = vlaneseq  ;;  %s475_s8 = sshll.u32 %s769_s5, 4  ;;  %vm359_vm4 = vcmask 253952  }
  0x20   : > { %v497_v4 = vpack.c.bf16 %v240_v2, %v239_v1  ;;  %v242_v5 = vld [vmem:[%s867_s1 + $0x18] sm:$0xff]  ;;  %v237_v6 = vld [vmem:[%s221_s11] sm:$0xff]  ;;  %v238_v8 = vld [vmem:[%s221_s11 + $0x8] sm:$0xff]  ;;  %s338_s9 = ssub.s32 52, %s475_s8  ;;  %s477_s5 = sshll.u32 %s659_s16, 7 }
  0x21   : > { %v501_v7 = vpack.c.bf16 %v242_v5, %v241_v3  ;;  %494 = vmatprep.mubr.msk.f32.mxu0 %vm250_vm1, %v237_v6  ;;  %v336_v10 = vshrl.u32 %v335_v9, 7  ;;  %v339_v12 = vstv %s338_s9  ;;  %v471_v13 = vld [vmem:[%s868_s2] ss:$0 sm:$0xff]  ;;  %v361_v40 = vld [vmem:[%s776_s20 + $0x1] sm:$0x1]  ;;  %s389_s11 = sshll.u32 %s776_s20, 4  ;;  %s810_s30 = scalar_lea.hbm %s869_s3, %s477_s5  ;;  %s812_s11 = int_to_ptr.vmem [resolvable:$true] %s389_s11 }
  0x22   : > { %498 = vmatprep.subr.bf16.mxu0 %v497_v4  ;;  %v348_v37 = vld [vmem:[%s776_s20] sm:$0x1]  ;;  %s376_s6 = scalar_lea.sflag [#allocation3], %s206_s29  ;;  %s577_s4 = scalar_lea.vmem %s812_s11, 128 }
  0x23   : > { %500 = vmatpush3.bf16.msra.mxu0 %v497_v4  ;;  %v337_v11 = vadd.s32 8, %v336_v10  ;;  %vm340_vm3 = vcmp.lt.s32.totalorder %v336_v10, %v339_v12  ;;  %p578_p1 = scmp.ne.s32.totalorder %s812_s11, %s577_s4  ;;  %s674_s16 = smov [#allocation2]  }
  0x24   : > { %502 = vmatprep.subr.bf16.mxu0 %v501_v7  ;;  %s581_s15 = sshll.u32 %s674_s16, 4  ;;  %s582_s15 = int_to_ptr.vmem [resolvable:$false] %s581_s15 }
  0x25   : > { %vm341_vm2 = vcmp.lt.s32.totalorder %v337_v11, %v339_v12  ;;  %p579_p2 = pnand %p578_p1, %p744_p3  ;;  %s583_s7 = scalar_lea.vmem %s582_s15, 256 }
  0x26   : > { %p584_p5 = scmp.lt.s32.totalorder %s812_s11, %s582_s15  ;;  %p585_p6 = scmp.lt.s32.totalorder %s583_s7, %s577_s4 }
  0x27   : > { %504 = vmatpush3.bf16.msra.mxu0 %v501_v7  ;;  %p580_p4 = pneg %p579_p2 }
  0x28   : > { %p586_p7 = por %p585_p6, %p584_p5 }
  0x2a   : > { %495 = vmatmul.mubr.msk.f32.vlgmr.msra.gmra.mrb[0].mxu0 %vm250_vm1, %v238_v8  ;;  %p587_p8 = pnand %p586_p7, %p580_p4 }
  0xfd   : > { %v496_v14 = vpop.f32.mrb[0].mxu0 }
  0xfe   : > { %v329_v15 = vadd.f32 %v496_v14, %v471_v13  ;;  %v323_v16 = vpop.f32.mrb[1].mxu0 }
  0xff   : > { %v324_v17 = vadd.f32 %v471_v13, %v323_v16 }
 0x100   : > { %v347_v18 = vsel %vm341_vm2, %v329_v15, 0.0 }
 0x101   : > { %v350_v19 = vsel %vm250_vm1, %v347_v18, 0.0  ;;  %v363_v20 = vmul.f32 %v347_v18, %v347_v18  ;;  %v346_v21 = vsel %vm340_vm3, %v324_v17, 0.0 }
 0x102   : > { %v349_v22 = vsel %vm250_vm1, %v346_v21, 0.0  ;;  %v362_v23 = vmul.f32 %v346_v21, %v346_v21 }
 0x103   : > { %v365_v24 = vsel %vm250_vm1, %v363_v20, 0.0  ;;  %v351_v25 = vadd.f32 %v350_v19, %v349_v22 }
 0x104   : > { %v364_v26 = vsel %vm250_vm1, %v362_v23, 0.0 }
 0x105   : > { %v352_v27 = vrot.slane %v351_v25, 4  ;;  %v366_v28 = vadd.f32 %v365_v24, %v364_v26 }
 0x107   : > { %v353_v29 = vadd.f32 %v352_v27, %v351_v25  ;;  %v367_v30 = vrot.slane %v366_v28, 4 }
 0x109   : > { %v354_v31 = vrot.slane %v353_v29, 2  ;;  %v368_v32 = vadd.f32 %v367_v30, %v366_v28 }
 0x10b   : > { %v355_v33 = vadd.f32 %v354_v31, %v353_v29  ;;  %v369_v34 = vrot.slane %v368_v32, 2 }
 0x10d   : > { %v356_v35 = vrot.slane %v355_v33, 1  ;;  %v370_v36 = vadd.f32 %v369_v34, %v368_v32 }
 0x10f   : > { %v357_v38 = vadd.f32 %v356_v35, %v355_v33  ;;  %v371_v39 = vrot.slane %v370_v36, 1 }
 0x111   : > { %v358_v41 = vadd.f32 %v357_v38, %v348_v37  ;;  %v372_v42 = vadd.f32 %v371_v39, %v370_v36 }
 0x113   : > { %360 = vst.msk [vmem:[%s776_s20] sm:$0x1] %vm359_vm4, %v358_v41  ;;  %v373_v43 = vadd.f32 %v372_v42, %v361_v40 }
 0x115   : > { %374 = vst.msk [vmem:[%s776_s20 + $0x1] sm:$0x1] %vm359_vm4, %v373_v43 }
 0x116   : > { %590 = shalt.err (!%p587_p8)
}
 0x117   : > { %s591_s29 = scalar_lea.hbm %s810_s30, 128  ;;  %s595_s9 = scalar_lea.hbm %s869_s3, 256 }
 0x118   : > { %p592_p10 = scmp.ne.s32.totalorder %s810_s30, %s591_s29  ;;  %p596_p13 = scmp.lt.u32.totalorder %s810_s30, %s869_s3 }
 0x119   : > { %p597_p0 = scmp.lt.u32.totalorder %s595_s9, %s591_s29  ;;  %p599_p2 = scmp.lt.u32.totalorder %s591_s29, %s810_s30 }
 0x11a   : > { %p593_p11 = pnand %p592_p10, %p744_p3 }
 0x11b   : > { %p598_p1 = por %p597_p0, %p596_p13 }
 0x11c   : > { %p594_p12 = pneg %p593_p11 }
 0x11d   : > { %p600_p4 = por %p599_p2, %p598_p1 }
 0x11f   : > { %p601_p5 = pnand %p600_p4, %p594_p12 }
 0x121   : > { %604 = shalt.err (!%p601_p5)
}
 0x122   : > { %505 = dma.vmem_to_hbm [thread:$0]  (%p744_p3), %s812_s11, 128, %s810_s30, %s376_s6  }
 0x123 PF: > { %p511_p6 = scmp.ge.s32.totalorder %s671_s19, 2  ;;  %s401_s5 = sand.u32 1, %s643_s12  }
 0x124   : > { %s402_s26 = scalar_lea.sflag [#allocation3], %s401_s5 }
 0x125   : > { %p508_p7 = pnand %p511_p6, %p754_p9 }
 0x127   : > { %638 = dma.done.wait (!%p508_p7), %s402_s26, 128  }
 0x128   : > { %640 = vsyncadd (!%p508_p7), %s402_s26, 4294967168  ;;  %s16_s19 = sadd.s32 1, %s671_s19   ;;  %s872_s12 = smov %s647_s13 }
 0x129   : > { %p13_p8 = scmp.ge.s32.totalorder %s16_s19, 6   ;;  %s873_s13 = smov %s651_s14 }
 0x12a   : > { %s874_s14 = smov %s762_s28  ;;  %s875_s15 = smov %s663_s17 }
 0x12b   : > { %s876_s16 = smov %s667_s18  ;;  %s877_s17 = smov %s880_s22 }
 0x12c   : > { %s878_s18 = smov %s884_s23  ;;  %15 = sbr.rel (!%p13_p8) target bundleno = 5 (0x5), region = 71 }
 0x133   :  { %407 = vsyncpa [#allocation3], 1 }
 0x134   :  { %409 = vsyncpa [#allocation3 + $0x1], 1 }

</bundles_post_ra>
